<compile_context>
chip_gen: v5e
topology: v5e:2x2
jax: 0.10.0
libtpu: 0.0.40
codegen_flags: <defaults>
</compile_context>

<pallas_src>
import functools

import jax
import jax.numpy as jnp
from jax.experimental import pallas as pl
from jax.experimental.pallas import tpu as pltpu


def _conv_kernel(x_ref, w_ref, b_ref, o_ref, *, W, KH, KW):
    # x_ref: (N, Cp, H*W)        activations, NCHW with spatial flattened,
    #                            channels zero-padded to Cp (multiple of 8)
    # w_ref: (Cout, KH*KW*Cp)    weights, columns ordered (kh, kw, ci_pad)
    # b_ref: (Cout, 1)           bias
    # o_ref: (N, Cout, H*W)      full-window output (valid slice done outside)
    N, Cp, HW = x_ref.shape
    L = N * HW

    x = x_ref[...]
    # Fuse batch into the lane axis: (Cp, N*H*W).  Block boundaries sit at
    # multiples of HW (128-aligned), so this is free vreg stacking.
    xf = jnp.concatenate([x[n] for n in range(N)], axis=1)

    # Transposed im2col via XLU lane rotations: tap block (kh, kw) holds xf
    # rotated left by s = kh*W + kw lanes (roll shift = (L - s) % L).  Wrapped
    # values (incl. cross-image wrap) only land in columns with ho >= Ho or
    # wo >= Wo, which the wrapper-side valid slice discards.
    taps = []
    for kh in range(KH):
        for kw in range(KW):
            s = kh * W + kw
            taps.append(xf if s == 0 else pltpu.roll(xf, (L - s) % L, 1))
    # Each tap block is a full Cp(=8)-row sublane group -> free stacking.
    patches = jnp.concatenate(taps, axis=0)  # (KH*KW*Cp, N*H*W)

    # Single MXU contraction for the whole batch; result is channel-major.
    acc = jnp.dot(w_ref[...], patches, preferred_element_type=jnp.float32)
    acc = acc + b_ref[...]  # one bias broadcast for the whole batch

    # Lane-dense, unmasked stores: each per-image slice starts at a
    # 128-aligned lane offset and spans HW = 256 lanes.
    for n in range(N):
        o_ref[n, :, :] = acc[:, n * HW:(n + 1) * HW].astype(o_ref.dtype)


@jax.jit
def fixed_conv_layer(x_nchw, kernel_hwio, bias):
    """Replicates FixedConvLayer.forward. x_nchw: (N, C, H, W) float32."""
    N, C, H, W = x_nchw.shape
    KH, KW, Cin, Cout = kernel_hwio.shape
    assert Cin == C
    Ho, Wo = H - KH + 1, W - KW + 1
    Cp = ((Cin + 7) // 8) * 8  # sublane-aligned channel count

    # Activations: free row-major reshape + tiny zero-pad of the channel axis.
    x_flat = x_nchw.reshape(N, C, H * W)
    x_flat = jnp.pad(x_flat, ((0, 0), (0, Cp - Cin), (0, 0)))

    # Weight prep (~2 KiB, negligible): (KH,KW,Cin,Cout) -> (Cout, KH*KW*Cp)
    # with columns ordered (kh, kw, ci_pad) to match the in-kernel patch rows.
    w = jnp.transpose(kernel_hwio, (3, 0, 1, 2))              # (Cout,KH,KW,Cin)
    w = jnp.pad(w, ((0, 0), (0, 0), (0, 0), (0, Cp - Cin)))   # (Cout,KH,KW,Cp)
    w2d = w.reshape(Cout, KH * KW * Cp)
    b2d = bias.reshape(Cout, 1)

    kernel_fn = functools.partial(_conv_kernel, W=W, KH=KH, KW=KW)

    # Collapsed grid: one invocation, everything resident in VMEM (~40 KiB).
    out = pl.pallas_call(
        kernel_fn,
        out_shape=jax.ShapeDtypeStruct((N, Cout, H * W), x_nchw.dtype),
        in_specs=[
            pl.BlockSpec(memory_space=pltpu.MemorySpace.VMEM),
            pl.BlockSpec(memory_space=pltpu.MemorySpace.VMEM),
            pl.BlockSpec(memory_space=pltpu.MemorySpace.VMEM),
        ],
        out_specs=pl.BlockSpec(memory_space=pltpu.MemorySpace.VMEM),
    )(x_flat, w2d, b2d)

    # Free reshape back to NCHW + tiny valid-window slice.
    return out.reshape(N, Cout, H, W)[:, :, :Ho, :Wo]


if __name__ == "__main__":
    key = jax.random.PRNGKey(0)
    kx, kw, kb = jax.random.split(key, 3)

    # Small shapes consistent with the module: batch=2, C_in=4, 16x16 spatial,
    # 3x3 kernel, C_out=8.
    N, C, H, W = 2, 4, 16, 16
    KH, KW, Cout = 3, 3, 8

    x = jax.random.normal(kx, (N, C, H, W), jnp.float32)
    kernel = jax.random.normal(kw, (KH, KW, C, Cout), jnp.float32) * 0.1
    bias = jax.random.normal(kb, (Cout,), jnp.float32) * 0.1

    y = fixed_conv_layer(x, kernel, bias)
    y = jax.block_until_ready(y)

    # Reference check against XLA's conv (NHWC / HWIO, VALID, stride 1).
    x_nhwc = jnp.transpose(x, (0, 2, 3, 1))
    ref = jax.lax.conv_general_dilated(
        x_nhwc, kernel, window_strides=(1, 1), padding="VALID",
        dimension_numbers=("NHWC", "HWIO", "NHWC"),
    ) + bias
    ref = jnp.transpose(ref, (0, 3, 1, 2))

    assert y.shape == (N, Cout, H - KH + 1, W - KW + 1)
    assert jnp.allclose(y, ref, atol=1e-4, rtol=1e-4)
    print("KERNEL_OK")
</pallas_src>

<mosaic_0001>
module attributes {stable_mosaic.version = 11 : i64} {
  func.func @_conv_kernel(%arg0: memref<2x8x256xf32, #tpu.memory_space<vmem>>, %arg1: memref<8x72xf32, #tpu.memory_space<vmem>>, %arg2: memref<8x1xf32, #tpu.memory_space<vmem>>, %arg3: memref<2x8x256xf32, #tpu.memory_space<vmem>>) attributes {dimension_semantics = [], scalar_prefetch = 0 : i64, scratch_operands = 0 : i64, tpu.core_type = #tpu.core_type<tc>} {
    %c0 = arith.constant 0 : index
    %c0_0 = arith.constant 0 : index
    %c0_1 = arith.constant 0 : index
    %0 = vector.load %arg0[%c0, %c0_0, %c0_1] : memref<2x8x256xf32, #tpu.memory_space<vmem>>, vector<2x8x256xf32>
    %1 = vector.extract_strided_slice %0 {offsets = [0, 0, 0], sizes = [1, 8, 256], strides = [1, 1, 1]} : vector<2x8x256xf32> to vector<1x8x256xf32>
    %2 = vector.shape_cast %1 : vector<1x8x256xf32> to vector<8x256xf32>
    %3 = vector.extract_strided_slice %0 {offsets = [1, 0, 0], sizes = [1, 8, 256], strides = [1, 1, 1]} : vector<2x8x256xf32> to vector<1x8x256xf32>
    %4 = vector.shape_cast %3 : vector<1x8x256xf32> to vector<8x256xf32>
    %5 = tpu.concatenate %2, %4 in 1 : vector<8x256xf32>, vector<8x256xf32> -> vector<8x512xf32>
    %c511_i32 = arith.constant 511 : i32
    %6 = tpu.dynamic_rotate %5 by %c511_i32 dim 1 : vector<8x512xf32>, i32 -> vector<8x512xf32>
    %c510_i32 = arith.constant 510 : i32
    %7 = tpu.dynamic_rotate %5 by %c510_i32 dim 1 : vector<8x512xf32>, i32 -> vector<8x512xf32>
    %c496_i32 = arith.constant 496 : i32
    %8 = tpu.dynamic_rotate %5 by %c496_i32 dim 1 : vector<8x512xf32>, i32 -> vector<8x512xf32>
    %c495_i32 = arith.constant 495 : i32
    %9 = tpu.dynamic_rotate %5 by %c495_i32 dim 1 : vector<8x512xf32>, i32 -> vector<8x512xf32>
    %c494_i32 = arith.constant 494 : i32
    %10 = tpu.dynamic_rotate %5 by %c494_i32 dim 1 : vector<8x512xf32>, i32 -> vector<8x512xf32>
    %c480_i32 = arith.constant 480 : i32
    %11 = tpu.dynamic_rotate %5 by %c480_i32 dim 1 : vector<8x512xf32>, i32 -> vector<8x512xf32>
    %c479_i32 = arith.constant 479 : i32
    %12 = tpu.dynamic_rotate %5 by %c479_i32 dim 1 : vector<8x512xf32>, i32 -> vector<8x512xf32>
    %c478_i32 = arith.constant 478 : i32
    %13 = tpu.dynamic_rotate %5 by %c478_i32 dim 1 : vector<8x512xf32>, i32 -> vector<8x512xf32>
    %14 = tpu.concatenate %5, %6, %7, %8, %9, %10, %11, %12, %13 in 0 : vector<8x512xf32>, vector<8x512xf32>, vector<8x512xf32>, vector<8x512xf32>, vector<8x512xf32>, vector<8x512xf32>, vector<8x512xf32>, vector<8x512xf32>, vector<8x512xf32> -> vector<72x512xf32>
    %c0_2 = arith.constant 0 : index
    %c0_3 = arith.constant 0 : index
    %15 = vector.load %arg1[%c0_2, %c0_3] : memref<8x72xf32, #tpu.memory_space<vmem>>, vector<8x72xf32>
    %cst = arith.constant dense<0.000000e+00> : vector<8x512xf32>
    %16 = tpu.matmul %15, %14, %cst {dimension_numbers = #tpu.dot_dimension_numbers<[1], [0], [0], [1], [0, 0, 1, 1], [], []>} : vector<8x72xf32>, vector<72x512xf32>, vector<8x512xf32> -> vector<8x512xf32>
    %c0_4 = arith.constant 0 : index
    %c0_5 = arith.constant 0 : index
    %17 = vector.load %arg2[%c0_4, %c0_5] : memref<8x1xf32, #tpu.memory_space<vmem>>, vector<8x1xf32>
    %18 = vector.broadcast %17 : vector<8x1xf32> to vector<8x512xf32>
    %19 = arith.addf %16, %18 : vector<8x512xf32>
    %20 = vector.extract_strided_slice %19 {offsets = [0, 0], sizes = [8, 256], strides = [1, 1]} : vector<8x512xf32> to vector<8x256xf32>
    %c0_6 = arith.constant 0 : index
    %c0_7 = arith.constant 0 : index
    %c0_8 = arith.constant 0 : index
    %21 = vector.load %arg3[%c0_6, %c0_7, %c0_8] : memref<2x8x256xf32, #tpu.memory_space<vmem>>, vector<1x8x256xf32>
    %22 = vector.shape_cast %21 : vector<1x8x256xf32> to vector<8x256xf32>
    %23 = vector.shape_cast %20 : vector<8x256xf32> to vector<1x8x256xf32>
    tpu.vector_store %arg3[%c0_6, %c0_7, %c0_8], %23 {strides = array<i32>} : memref<2x8x256xf32, #tpu.memory_space<vmem>>, vector<1x8x256xf32>,
    %24 = vector.extract_strided_slice %19 {offsets = [0, 256], sizes = [8, 256], strides = [1, 1]} : vector<8x512xf32> to vector<8x256xf32>
    %c1 = arith.constant 1 : index
    %c0_9 = arith.constant 0 : index
    %c0_10 = arith.constant 0 : index
    %25 = vector.load %arg3[%c1, %c0_9, %c0_10] : memref<2x8x256xf32, #tpu.memory_space<vmem>>, vector<1x8x256xf32>
    %26 = vector.shape_cast %25 : vector<1x8x256xf32> to vector<8x256xf32>
    %27 = vector.shape_cast %24 : vector<8x256xf32> to vector<1x8x256xf32>
    tpu.vector_store %arg3[%c1, %c0_9, %c0_10], %27 {strides = array<i32>} : memref<2x8x256xf32, #tpu.memory_space<vmem>>, vector<1x8x256xf32>,
    return
  }
}

</mosaic_0001>

<bundles_post_ra>
// kernel: fixed_conv_layer.1
= control target key start
LH: loop header
LB: loop body
LE: loop exit
PB: predicated region body
PF: predicated region fallthrough
CT: control target
= control target key end

     0   :  { %s301_s16 = smov 95   ;;  %s302_s17 = smov 94   ;;  %v26_v10 = vlaneseq  ;;  %v309_v55 = vmov 0   ;;  %vm131_vm8 = vcmask 588800   ;;  %s458_s0 = inlined_call_operand.vmem [shape: f32[2,8,256], index: 0, kind: input, shape index: {}]   ;;  %s459_s2 = inlined_call_operand.vmem [shape: f32[8,1], index: 2, kind: input, shape index: {}]   ;;  %s460_s1 = inlined_call_operand.vmem [shape: f32[8,72], index: 1, kind: input, shape index: {}]   ;;  %s461_s3 = inlined_call_operand.vmem [shape: f32[2,8,256], index: 3, kind: output, shape index: {}]  }
   0x1   :  { %v333_v0 = vld [vmem:[%s458_s0] sm:$0xff]  ;;  %v338_v1 = vld [vmem:[%s458_s0 + $0x10] sm:$0xff]  ;;  %v345_v3 = vld [vmem:[%s458_s0 + $0x8] sm:$0xff]  ;;  %s303_s22 = smov 96   ;;  %s304_s23 = smov 110   ;;  %299 = vset.pattern.permute.xlu2 %v309_v55  ;;  %300 = vset.pattern.permute.xlu0 %v309_v55 }
   0x2   :  { %v249_v2 = vpack.i.bf16 %v338_v1, %v333_v0  ;;  %v350_v4 = vld [vmem:[%s458_s0 + $0x18] sm:$0xff]  ;;  %s305_s24 = smov 111   ;;  %s306_s25 = smov 112   ;;  %v362_v11 = vand.u32 127, %v26_v10  ;;  %v125_v52 = vld [vmem:[%s459_s2] sm:$0xff] }
   0x3   :  { %v254_v5 = vpack.i.bf16 %v345_v3, %v350_v4  ;;  %s307_s0 = smov 126   ;;  %s308_s26 = smov 127  }
   0x4   :  { %250 = vrot.lane.b32.xlu1 %v249_v2, %s301_s16  ;;  %240 = vrot.lane.b32.xlu0 %v249_v2, %s302_s17  ;;  %vm119_vm0 = vcmp.lt.s32.totalorder %v362_v11, 94  ;;  %vm106_vm1 = vcmp.lt.s32.totalorder %v362_v11, 95  ;;  %vm93_vm2 = vcmp.lt.s32.totalorder %v362_v11, 96  ;;  %vm80_vm3 = vcmp.lt.s32.totalorder %v362_v11, 110 }
   0x5   :  { %260 = vrot.lane.b32.xlu2 %v249_v2, %s303_s22  ;;  %vm67_vm4 = vcmp.lt.s32.totalorder %v362_v11, 111  ;;  %vm54_vm5 = vcmp.lt.s32.totalorder %v362_v11, 112  ;;  %vm41_vm6 = vcmp.lt.s32.totalorder %v362_v11, 126  ;;  %vm28_vm7 = vcmp.lt.s32.totalorder %v362_v11, 127 }
   0xc   :  { %255 = vrot.lane.b32.xlu1 %v254_v5, %s301_s16  ;;  %245 = vrot.lane.b32.xlu0 %v254_v5, %s302_s17 }
   0xd   :  { %265 = vrot.lane.b32.xlu2 %v254_v5, %s303_s22 }
  0x14   :  { %275 = vrot.lane.b32.xlu1 %v254_v5, %s304_s23  ;;  %270 = vrot.lane.b32.xlu0 %v249_v2, %s304_s23 }
  0x15   :  { %280 = vrot.lane.b32.xlu2 %v249_v2, %s305_s24 }
  0x1c   :  { %285 = vrot.lane.b32.xlu1 %v249_v2, %s306_s25  ;;  %65 = vrot.lane.b32.xlu0 %v350_v4, %s305_s24 }
  0x1d   :  { %52 = vrot.lane.b32.xlu2 %v350_v4, %s306_s25 }
  0x24   :  { %39 = vrot.lane.b32.xlu1 %v350_v4, %s307_s0  ;;  %290 = vrot.lane.b32.xlu0 %v249_v2, %s307_s0 }
  0x25   :  { %295 = vrot.lane.b32.xlu2 %v249_v2, %s308_s26 }
  0x2c   :  { %61 = vrot.lane.b32.xlu1 %v345_v3, %s305_s24  ;;  %24 = vrot.lane.b32.xlu0 %v350_v4, %s308_s26 }
  0x2d   :  { %48 = vrot.lane.b32.xlu2 %v345_v3, %s306_s25 }
  0x34   :  { %20 = vrot.lane.b32.xlu1 %v345_v3, %s308_s26  ;;  %35 = vrot.lane.b32.xlu0 %v345_v3, %s307_s0 }
  0x35   :  { %128 = vperm.xlu2 %299, %v125_v52  }
  0x5f   :  { %v261_v6 = vpop.permute.xlu2 %260 }
  0x60   :  { %v263_v12 = vunpack.i.h.bf16 %v261_v6  ;;  %v262_v13 = vunpack.i.l.bf16 %v261_v6 }
  0x67   :  { %v266_v7 = vpop.permute.xlu2 %265 }
  0x68   :  { %v268_v22 = vunpack.i.h.bf16 %v266_v7  ;;  %v267_v30 = vunpack.i.l.bf16 %v266_v7 }
  0x6a   :  { %v96_v35 = vsel %vm93_vm2, %v262_v13, %v268_v22  ;;  %v95_v36 = vsel %vm93_vm2, %v268_v22, %v263_v12  ;;  %v94_v39 = vsel %vm93_vm2, %v263_v12, %v267_v30  ;;  %v97_v40 = vsel %vm93_vm2, %v267_v30, %v262_v13 }
  0x6f   :  { %v366_v18 = vpop.permute.xlu2 %280 }
  0x70   :  { %v283_v50 = vunpack.i.h.bf16 %v366_v18  ;;  %v282_v51 = vunpack.i.l.bf16 %v366_v18 }
  0x76   :  { %v251_v8 = vpop.permute.xlu1 %250  ;;  %v241_v9 = vpop.permute.xlu0 %240 }
  0x77   :  { %v243_v14 = vunpack.i.h.bf16 %v241_v9  ;;  %v242_v17 = vunpack.i.l.bf16 %v241_v9  ;;  %v253_v23 = vunpack.i.h.bf16 %v251_v8  ;;  %v252_v24 = vunpack.i.l.bf16 %v251_v8  ;;  %v53_v45 = vpop.permute.xlu2 %52 }
  0x7e   :  { %v256_v15 = vpop.permute.xlu1 %255  ;;  %v246_v16 = vpop.permute.xlu0 %245 }
  0x7f   :  { %v258_v19 = vunpack.i.h.bf16 %v256_v15  ;;  %v248_v20 = vunpack.i.h.bf16 %v246_v16  ;;  %v247_v21 = vunpack.i.l.bf16 %v246_v16  ;;  %v257_v25 = vunpack.i.l.bf16 %v256_v15  ;;  %v296_v62 = vpop.permute.xlu2 %295 }
  0x80   :  { %v298_v9 = vunpack.i.h.bf16 %v296_v62  ;;  %v297_v10 = vunpack.i.l.bf16 %v296_v62 }
  0x81   :  { %v122_v26 = vsel %vm119_vm0, %v242_v17, %v248_v20  ;;  %v121_v27 = vsel %vm119_vm0, %v248_v20, %v243_v14  ;;  %v120_v28 = vsel %vm119_vm0, %v243_v14, %v247_v21  ;;  %v123_v29 = vsel %vm119_vm0, %v247_v21, %v242_v17  ;;  %v124_v21 = vld [vmem:[%s460_s1] sm:$0xff] }
  0x82   :  { %142 = vmatpush.msra.mxu0 %v122_v26  ;;  %162 = vmatpush.msra.mxu1 %v121_v27  ;;  %v109_v31 = vsel %vm106_vm1, %v252_v24, %v258_v19  ;;  %v108_v32 = vsel %vm106_vm1, %v258_v19, %v253_v23  ;;  %v107_v33 = vsel %vm106_vm1, %v253_v23, %v257_v25 }
  0x83   :  { %182 = vmatpush.msra.mxu2 %v120_v28  ;;  %202 = vmatpush.msra.mxu3 %v123_v29  ;;  %v110_v34 = vsel %vm106_vm1, %v257_v25, %v252_v24 }
  0x84   :  { %143 = vmatpush.msra.mxu0 %v109_v31  ;;  %163 = vmatpush.msra.mxu1 %v108_v32 }
  0x85   :  { %183 = vmatpush.msra.mxu2 %v107_v33  ;;  %203 = vmatpush.msra.mxu3 %v110_v34 }
  0x86   :  { %v276_v37 = vpop.permute.xlu1 %275  ;;  %v271_v38 = vpop.permute.xlu0 %270  ;;  %144 = vmatpush.msra.mxu0 %v96_v35  ;;  %164 = vmatpush.msra.mxu1 %v95_v36 }
  0x87   :  { %v278_v41 = vunpack.i.h.bf16 %v276_v37  ;;  %v277_v42 = vunpack.i.l.bf16 %v276_v37  ;;  %v273_v43 = vunpack.i.h.bf16 %v271_v38  ;;  %v272_v44 = vunpack.i.l.bf16 %v271_v38  ;;  %184 = vmatpush.msra.mxu2 %v94_v39  ;;  %204 = vmatpush.msra.mxu3 %v97_v40  ;;  %v49_v12 = vpop.permute.xlu2 %48 }
  0x89   :  { %v83_v46 = vsel %vm80_vm3, %v272_v44, %v278_v41  ;;  %v82_v47 = vsel %vm80_vm3, %v278_v41, %v273_v43  ;;  %v81_v48 = vsel %vm80_vm3, %v273_v43, %v277_v42  ;;  %v84_v49 = vsel %vm80_vm3, %v277_v42, %v272_v44 }
  0x8a   :  { %145 = vmatpush.msra.mxu0 %v83_v46  ;;  %165 = vmatpush.msra.mxu1 %v82_v47 }
  0x8b   :  { %185 = vmatpush.msra.mxu2 %v81_v48  ;;  %205 = vmatpush.msra.mxu3 %v84_v49 }
  0x8e   :  { %v286_v53 = vpop.permute.xlu1 %285  ;;  %v66_v54 = vpop.permute.xlu0 %65 }
  0x8f   :  { %v288_v56 = vunpack.i.h.bf16 %v286_v53  ;;  %v287_v57 = vunpack.i.l.bf16 %v286_v53  ;;  %v68_v58 = vsel %vm67_vm4, %v283_v50, %v66_v54  ;;  %v71_v59 = vsel %vm67_vm4, %v66_v54, %v282_v51 }
  0x90   :  { %186 = vmatpush.msra.mxu2 %v68_v58  ;;  %206 = vmatpush.msra.mxu3 %v71_v59 }
  0x91   :  { %v55_v60 = vsel %vm54_vm5, %v288_v56, %v53_v45  ;;  %v58_v61 = vsel %vm54_vm5, %v53_v45, %v287_v57  ;;  %v57_v19 = vsel %vm54_vm5, %v287_v57, %v49_v12  ;;  %v56_v20 = vsel %vm54_vm5, %v49_v12, %v288_v56 }
  0x92   :  { %187 = vmatpush.msra.mxu2 %v55_v60  ;;  %207 = vmatpush.msra.mxu3 %v58_v61 }
  0x96   :  { %v40_v63 = vpop.permute.xlu1 %39  ;;  %v291_v2 = vpop.permute.xlu0 %290 }
  0x97   :  { %v293_v5 = vunpack.i.h.bf16 %v291_v2  ;;  %v292_v6 = vunpack.i.l.bf16 %v291_v2 }
  0x99   :  { %v42_v7 = vsel %vm41_vm6, %v293_v5, %v40_v63  ;;  %v45_v8 = vsel %vm41_vm6, %v40_v63, %v292_v6 }
  0x9a   :  { %188 = vmatpush.msra.mxu2 %v42_v7  ;;  %208 = vmatpush.msra.mxu3 %v45_v8 }
  0x9e   :  { %v62_v13 = vpop.permute.xlu1 %61  ;;  %v25_v14 = vpop.permute.xlu0 %24 }
  0x9f   :  { %v70_v15 = vsel %vm67_vm4, %v282_v51, %v62_v13  ;;  %v69_v16 = vsel %vm67_vm4, %v62_v13, %v283_v50  ;;  %v29_v17 = vsel %vm28_vm7, %v298_v9, %v25_v14  ;;  %v32_v18 = vsel %vm28_vm7, %v25_v14, %v297_v10 }
  0xa0   :  { %146 = vmatpush.msra.mxu0 %v70_v15  ;;  %166 = vmatpush.msra.mxu1 %v69_v16 }
  0xa1   :  { %189 = vmatpush.msra.mxu2 %v29_v17  ;;  %209 = vmatpush.msra.mxu3 %v32_v18 }
  0xa2   :  { %147 = vmatpush.msra.mxu0 %v57_v19  ;;  %167 = vmatpush.msra.mxu1 %v56_v20 }
  0xa3   :  { %190 = vmatpush.msra.mxu2 %v338_v1  ;;  %210 = vmatpush.msra.mxu3 %v350_v4  ;;  %v129_v4 = vpop.permute.xlu2 %128 }
  0xa4   :  { %226 = vmatmul.msk.f32.vlgmr.msra.gmra.mxu2 %vm131_vm8, %v124_v21  ;;  %227 = vmatmul.msk.f32.vlgmr.msra.gmra.mxu3 %vm131_vm8, %v124_v21 }
  0xa6   :  { %v21_v22 = vpop.permute.xlu1 %20  ;;  %v36_v23 = vpop.permute.xlu0 %35 }
  0xa7   :  { %v44_v24 = vsel %vm41_vm6, %v292_v6, %v36_v23  ;;  %v43_v25 = vsel %vm41_vm6, %v36_v23, %v293_v5  ;;  %v31_v26 = vsel %vm28_vm7, %v297_v10, %v21_v22  ;;  %v30_v1 = vsel %vm28_vm7, %v21_v22, %v298_v9 }
  0xa8   :  { %148 = vmatpush.msra.mxu0 %v44_v24  ;;  %168 = vmatpush.msra.mxu1 %v43_v25 }
  0xaa   :  { %149 = vmatpush.msra.mxu0 %v31_v26  ;;  %169 = vmatpush.msra.mxu1 %v30_v1 }
  0xac   :  { %150 = vmatpush.msra.mxu0 %v333_v0  ;;  %170 = vmatpush.msra.mxu1 %v345_v3 }
  0xad   :  { %224 = vmatmul.msk.f32.vlgmr.msra.gmra.mxu0 %vm131_vm8, %v124_v21  ;;  %225 = vmatmul.msk.f32.vlgmr.msra.gmra.mxu1 %vm131_vm8, %v124_v21 }
 0x127   :  { %v192_v27 = vpop.f32.mrf.mxu2  ;;  %v212_v28 = vpop.f32.mrf.mxu3 }
 0x128   :  { %v193_v29 = vadd.f32 %v192_v27, %v129_v4  ;;  %v213_v30 = vadd.f32 %v212_v28, %v129_v4 }
 0x12a   :  { %v152_v31 = vpop.f32.mrf.mxu0  ;;  %v172_v32 = vpop.f32.mrf.mxu1  ;;  %228 = vst [vmem:[%s461_s3 + $0x10] sm:$0xff] %v193_v29 }
 0x12b   :  { %v153_v11 = vadd.f32 %v152_v31, %v129_v4  ;;  %v173_v33 = vadd.f32 %v172_v32, %v129_v4  ;;  %229 = vst [vmem:[%s461_s3 + $0x18] sm:$0xff] %v213_v30 }
 0x12d   :  { %215 = vst [vmem:[%s461_s3] sm:$0xff] %v153_v11 }
 0x12e   :  { %216 = vst [vmem:[%s461_s3 + $0x8] sm:$0xff] %v173_v33 }

</bundles_post_ra>
